<compile_context>
chip_gen: v6e
topology: v6e:2x2x1
jax: 0.10.0
libtpu: 0.0.40
codegen_flags: <defaults>
</compile_context>

<pallas_src>
import functools

import jax
import jax.numpy as jnp
import numpy as np
from jax.experimental import pallas as pl
from jax.experimental.pallas import tpu as pltpu

LANES = 128                # lane width (last dim)
MAX_ROWS_PER_STEP = 2048   # 2048*128 = 262144 points / grid step (3MB*2 VMEM)
CHUNK_ROWS = 32            # rows per in-register chunk inside the kernel


def _round_up(x, m):
    return ((x + m - 1) // m) * m


# --------------------------------------------------------------------------
# Kernels
# --------------------------------------------------------------------------
def ifs_kernel_folded(params_ref, x_ref, y_ref, out_ref, *,
                      n_pairs, chunk, unit_scale):
    """Fast path: every (transform, sdf) pair folded into a shifted circle.

    params_ref : SMEM (P*4,) f32 -- [cx, cy, r*mult, mult*sigma] per pair
    x_ref/y_ref: VMEM (TM, 128) f32 -- point coordinates
    out_ref    : VMEM (TM, 128) f32 -- min distance over all pairs
    """
    # Hoist all SMEM scalar reads above the chunk loop.
    cx = [params_ref[4 * p + 0] for p in range(n_pairs)]
    cy = [params_ref[4 * p + 1] for p in range(n_pairs)]
    rr = [params_ref[4 * p + 2] for p in range(n_pairs)]
    ww = [params_ref[4 * p + 3] for p in range(n_pairs)]

    tm = x_ref.shape[0]
    n_chunks = tm // chunk

    @pl.loop(0, n_chunks)
    def _(c):
        start = pl.multiple_of(c * chunk, chunk)
        x = x_ref[pl.ds(start, chunk), :]          # (chunk, 128)
        y = y_ref[pl.ds(start, chunk), :]
        best = jnp.full((chunk, LANES), jnp.inf, dtype=jnp.float32)

        for p in range(n_pairs):                   # static unroll (small T*S)
            dx = x - cx[p]
            dy = y - cy[p]
            d = jnp.sqrt(dx * dx + dy * dy)        # sqrt goes to EUP slot
            if not unit_scale:
                d = d * ww[p]
            best = jnp.minimum(best, d - rr[p])

        out_ref[pl.ds(start, chunk), :] = best


def ifs_kernel_general(coef_ref, mult_ref, cen_ref, rad_ref,
                       x_ref, y_ref, out_ref, *,
                       n_transforms, n_sdfs, chunk, factor_mult):
    """General fallback (arbitrary back-transform matrices).

    coef_ref : SMEM (T*6,) f32 -- top two rows of each inverse 3x3 matrix
    mult_ref : SMEM (T,)   f32 -- 1.0 / back_scale
    cen_ref  : SMEM (S*2,) f32 -- circle centers
    rad_ref  : SMEM (S,)   f32 -- circle radii
    """
    coefs = [[coef_ref[t * 6 + k] for k in range(6)] for t in range(n_transforms)]
    mults = [mult_ref[t] for t in range(n_transforms)]
    cens = [(cen_ref[2 * s], cen_ref[2 * s + 1]) for s in range(n_sdfs)]
    rads = [rad_ref[s] for s in range(n_sdfs)]

    tm = x_ref.shape[0]
    n_chunks = tm // chunk

    @pl.loop(0, n_chunks)
    def _(c):
        start = pl.multiple_of(c * chunk, chunk)
        x = x_ref[pl.ds(start, chunk), :]
        y = y_ref[pl.ds(start, chunk), :]
        best = jnp.full((chunk, LANES), jnp.inf, dtype=jnp.float32)

        for t in range(n_transforms):
            a00, a01, a02, a10, a11, a12 = coefs[t]
            mult = mults[t]
            xt = a00 * x + a01 * y + a02
            yt = a10 * x + a11 * y + a12

            if factor_mult:
                # valid because all back-scales (hence mults) are positive
                inner = jnp.full((chunk, LANES), jnp.inf, dtype=jnp.float32)
                for s in range(n_sdfs):
                    dx = xt - cens[s][0]
                    dy = yt - cens[s][1]
                    inner = jnp.minimum(inner,
                                        jnp.sqrt(dx * dx + dy * dy) - rads[s])
                best = jnp.minimum(best, mult * inner)
            else:
                for s in range(n_sdfs):
                    dx = xt - cens[s][0]
                    dy = yt - cens[s][1]
                    d = jnp.sqrt(dx * dx + dy * dy) - rads[s]
                    best = jnp.minimum(best, mult * d)

        out_ref[pl.ds(start, chunk), :] = best


# --------------------------------------------------------------------------
# Host-side transform composition (tiny 3x3 glue, numpy)
# --------------------------------------------------------------------------
def build_transforms(affine_params, depth):
    """Replicates the torch composition logic."""
    aft_mats = []
    for s, theta, tx, ty in affine_params:
        c, si = np.cos(theta), np.sin(theta)
        T = np.array([[s * c, -s * si, tx],
                      [s * si, s * c, ty],
                      [0.0, 0.0, 1.0]], dtype=np.float32)
        aft_mats.append((np.float32(s), T))

    back_aft_mats = [(1.0 / s, np.linalg.inv(T)) for s, T in aft_mats]

    back_transforms = [(np.float32(1.0), np.eye(3, dtype=np.float32))]
    for _ in range(depth):
        back_transforms = [(s1 * s2, np.matmul(T1, T2))
                           for s1, T1 in back_transforms
                           for s2, T2 in back_aft_mats]

    back_scales = np.array([s for s, _ in back_transforms], dtype=np.float32)
    back_mats = np.stack([T for _, T in back_transforms]).astype(np.float32)
    mults = (1.0 / back_scales).astype(np.float32)   # torch: 1.0/scale
    return back_mats, mults


def _fold_similarity(back_mats, mults, centers, radii, tol=1e-5):
    """If every back transform is sigma*R (R orthogonal), fold each
    (transform, sdf) pair into a shifted circle evaluated directly on the
    untransformed point.  Returns (params_flat, unit_scale) or None."""
    T = back_mats.shape[0]
    S = centers.shape[0]
    params = np.zeros((T * S, 4), dtype=np.float32)
    ws = np.zeros((T,), dtype=np.float64)
    for t in range(T):
        A = back_mats[t, :2, :2].astype(np.float64)
        b = back_mats[t, :2, 2].astype(np.float64)
        AtA = A.T @ A
        s2 = 0.5 * (AtA[0, 0] + AtA[1, 1])
        if not np.isfinite(s2) or s2 <= 0.0:
            return None
        if (abs(AtA[0, 1]) > tol * s2 or abs(AtA[1, 0]) > tol * s2
                or abs(AtA[0, 0] - AtA[1, 1]) > tol * s2):
            return None                                  # not a similarity
        sigma = np.sqrt(s2)
        w = float(mults[t]) * sigma
        ws[t] = w
        for s in range(S):
            cprime = A.T @ (centers[s].astype(np.float64) - b) / s2
            params[t * S + s, 0] = cprime[0]
            params[t * S + s, 1] = cprime[1]
            params[t * S + s, 2] = float(mults[t]) * float(radii[s])
            params[t * S + s, 3] = w
    unit_scale = bool(np.allclose(ws, 1.0, rtol=0.0, atol=1e-5))
    return params.reshape(-1), unit_scale


# --------------------------------------------------------------------------
# Wrapper
# --------------------------------------------------------------------------
def ifs_forward(query, affine_params, sdf_centers, sdf_radii, depth=3):
    """query: (N, 2) float -> (N,) float32 min distances."""
    back_mats, mults = build_transforms(affine_params, depth)
    n_transforms = back_mats.shape[0]
    centers_np = np.asarray(sdf_centers, dtype=np.float32)
    radii_np = np.asarray(sdf_radii, dtype=np.float32)
    n_sdfs = int(centers_np.shape[0])

    folded = _fold_similarity(back_mats, mults, centers_np, radii_np)

    # --- choose tiling --------------------------------------------------
    n = query.shape[0]
    rows = max(1, pl.cdiv(n, LANES))
    rows8 = _round_up(rows, 8)                  # sublane alignment
    if rows8 <= 16:
        tm = rows8                              # tiny input: single step
    else:
        # aim for >= 2 grid steps (v7x megacore) while capping per-step rows
        tm = min(MAX_ROWS_PER_STEP, _round_up(pl.cdiv(rows8, 2), 8))
    rows_pad = _round_up(rows8, tm)
    grid = rows_pad // tm

    chunk = min(CHUNK_ROWS, tm)
    while tm % chunk != 0:
        chunk //= 2
    chunk = max(chunk, 8)

    # --- layout: two (rows_pad, 128) planes, sublane+lane dense ---------
    # TODO(synk): this split/pad is an extra XLA pass over the query;
    # produce data in this layout upstream to remove it entirely.
    n_pad = rows_pad * LANES
    xcol = query[:, 0].astype(jnp.float32)
    ycol = query[:, 1].astype(jnp.float32)
    if n_pad > n:
        xcol = jnp.pad(xcol, (0, n_pad - n))
        ycol = jnp.pad(ycol, (0, n_pad - n))
    xq = xcol.reshape(rows_pad, LANES)
    yq = ycol.reshape(rows_pad, LANES)

    point_spec = pl.BlockSpec((tm, LANES), lambda i: (i, 0))
    smem_spec = pl.BlockSpec(memory_space=pltpu.MemorySpace.SMEM)

    if folded is not None:
        params_flat, unit_scale = folded
        kernel = functools.partial(ifs_kernel_folded,
                                   n_pairs=n_transforms * n_sdfs,
                                   chunk=chunk, unit_scale=unit_scale)
        smem_args = (jnp.asarray(params_flat, dtype=jnp.float32),)
        smem_specs = [smem_spec]
    else:
        factor_mult = bool(np.all(mults > 0.0))
        kernel = functools.partial(ifs_kernel_general,
                                   n_transforms=n_transforms, n_sdfs=n_sdfs,
                                   chunk=chunk, factor_mult=factor_mult)
        coefs = jnp.asarray(back_mats[:, :2, :].reshape(-1), dtype=jnp.float32)
        smem_args = (coefs,
                     jnp.asarray(mults, dtype=jnp.float32),
                     jnp.asarray(centers_np.reshape(-1), dtype=jnp.float32),
                     jnp.asarray(radii_np, dtype=jnp.float32))
        smem_specs = [smem_spec] * 4

    out = pl.pallas_call(
        kernel,
        out_shape=jax.ShapeDtypeStruct((rows_pad, LANES), jnp.float32),
        grid=(grid,),
        in_specs=smem_specs + [point_spec, point_spec],
        out_specs=point_spec,
        compiler_params=pltpu.CompilerParams(
            dimension_semantics=("parallel",)),
    )(*smem_args, xq, yq)

    return out.reshape(-1)[:n]


# --------------------------------------------------------------------------
# Pure-JAX reference mirroring the torch forward exactly
# --------------------------------------------------------------------------
def ifs_forward_ref(query, affine_params, sdf_centers, sdf_radii, depth=3):
    back_mats, mults = build_transforms(affine_params, depth)
    back_mats = jnp.asarray(back_mats)
    mults = jnp.asarray(mults)
    qpad = jnp.concatenate(
        [query.astype(jnp.float32), jnp.ones((query.shape[0], 1), jnp.float32)],
        axis=1)                                                  # (N,3)
    qt = jnp.einsum('tij,nj->tni', back_mats, qpad)              # (T,N,3)
    xy = qt[..., :2]                                             # (T,N,2)
    centers = jnp.asarray(sdf_centers, jnp.float32)
    radii = jnp.asarray(sdf_radii, jnp.float32)
    diff = xy[:, None, :, :] - centers[None, :, None, :]         # (T,S,N,2)
    d = jnp.sqrt(jnp.sum(diff * diff, axis=-1)) - radii[None, :, None]
    d = mults[:, None, None] * d                                 # (T,S,N)
    return d.min(axis=0).min(axis=0)


if __name__ == "__main__":
    key = jax.random.PRNGKey(0)

    # Deterministic "module parameters".
    affine_params = [  # (scale, rotation, tx, ty)
        (0.5, 0.3, 0.10, 0.20),
        (0.6, -0.4, -0.20, 0.15),
    ]
    sdf_centers = jnp.array([[0.0, 0.0],
                             [0.5, -0.25]], dtype=jnp.float32)
    sdf_radii = jnp.array([0.3, 0.2], dtype=jnp.float32)

    for n_pts in (8, 5000):   # small case + one that exercises chunk/grid loops
        key, sub = jax.random.split(key)
        query = jax.random.uniform(sub, (n_pts, 2), dtype=jnp.float32,
                                   minval=-1.0, maxval=1.0)
        dists = ifs_forward(query, affine_params, sdf_centers, sdf_radii,
                            depth=3)
        dists = jax.block_until_ready(dists)
        ref = ifs_forward_ref(query, affine_params, sdf_centers, sdf_radii,
                              depth=3)
        # Tolerance slightly loosened: the folded similarity formulation is
        # algebraically identical but rounds differently from the reference.
        np.testing.assert_allclose(np.asarray(dists), np.asarray(ref),
                                   rtol=1e-5, atol=2e-5)

    print("KERNEL_OK")
</pallas_src>

<mosaic_0001>
module attributes {stable_mosaic.version = 11 : i64} {
  func.func @ifs_kernel_folded(%arg0: i32, %arg1: memref<64xf32, #tpu.memory_space<smem>>, %arg2: memref<8x128xf32, #tpu.memory_space<vmem>>, %arg3: memref<8x128xf32, #tpu.memory_space<vmem>>, %arg4: memref<8x128xf32, #tpu.memory_space<vmem>>) attributes {dimension_semantics = [#tpu.dimension_semantics<parallel>], iteration_bounds = array<i64: 1>, scalar_prefetch = 0 : i64, scratch_operands = 0 : i64, tpu.core_type = #tpu.core_type<tc>, window_params = [{transform_indices = @transform_0, window_bounds = array<i64: 64>}, {transform_indices = @transform_1, window_bounds = array<i64: 8, 128>}, {transform_indices = @transform_2, window_bounds = array<i64: 8, 128>}, {transform_indices = @transform_3, window_bounds = array<i64: 8, 128>}]} {
    %c0 = arith.constant 0 : index
    %0 = memref.load %arg1[%c0] : memref<64xf32, #tpu.memory_space<smem>>
    %c4 = arith.constant 4 : index
    %1 = memref.load %arg1[%c4] : memref<64xf32, #tpu.memory_space<smem>>
    %c8 = arith.constant 8 : index
    %2 = memref.load %arg1[%c8] : memref<64xf32, #tpu.memory_space<smem>>
    %c12 = arith.constant 12 : index
    %3 = memref.load %arg1[%c12] : memref<64xf32, #tpu.memory_space<smem>>
    %c16 = arith.constant 16 : index
    %4 = memref.load %arg1[%c16] : memref<64xf32, #tpu.memory_space<smem>>
    %c20 = arith.constant 20 : index
    %5 = memref.load %arg1[%c20] : memref<64xf32, #tpu.memory_space<smem>>
    %c24 = arith.constant 24 : index
    %6 = memref.load %arg1[%c24] : memref<64xf32, #tpu.memory_space<smem>>
    %c28 = arith.constant 28 : index
    %7 = memref.load %arg1[%c28] : memref<64xf32, #tpu.memory_space<smem>>
    %c32 = arith.constant 32 : index
    %8 = memref.load %arg1[%c32] : memref<64xf32, #tpu.memory_space<smem>>
    %c36 = arith.constant 36 : index
    %9 = memref.load %arg1[%c36] : memref<64xf32, #tpu.memory_space<smem>>
    %c40 = arith.constant 40 : index
    %10 = memref.load %arg1[%c40] : memref<64xf32, #tpu.memory_space<smem>>
    %c44 = arith.constant 44 : index
    %11 = memref.load %arg1[%c44] : memref<64xf32, #tpu.memory_space<smem>>
    %c48 = arith.constant 48 : index
    %12 = memref.load %arg1[%c48] : memref<64xf32, #tpu.memory_space<smem>>
    %c52 = arith.constant 52 : index
    %13 = memref.load %arg1[%c52] : memref<64xf32, #tpu.memory_space<smem>>
    %c56 = arith.constant 56 : index
    %14 = memref.load %arg1[%c56] : memref<64xf32, #tpu.memory_space<smem>>
    %c60 = arith.constant 60 : index
    %15 = memref.load %arg1[%c60] : memref<64xf32, #tpu.memory_space<smem>>
    %c1 = arith.constant 1 : index
    %16 = memref.load %arg1[%c1] : memref<64xf32, #tpu.memory_space<smem>>
    %c5 = arith.constant 5 : index
    %17 = memref.load %arg1[%c5] : memref<64xf32, #tpu.memory_space<smem>>
    %c9 = arith.constant 9 : index
    %18 = memref.load %arg1[%c9] : memref<64xf32, #tpu.memory_space<smem>>
    %c13 = arith.constant 13 : index
    %19 = memref.load %arg1[%c13] : memref<64xf32, #tpu.memory_space<smem>>
    %c17 = arith.constant 17 : index
    %20 = memref.load %arg1[%c17] : memref<64xf32, #tpu.memory_space<smem>>
    %c21 = arith.constant 21 : index
    %21 = memref.load %arg1[%c21] : memref<64xf32, #tpu.memory_space<smem>>
    %c25 = arith.constant 25 : index
    %22 = memref.load %arg1[%c25] : memref<64xf32, #tpu.memory_space<smem>>
    %c29 = arith.constant 29 : index
    %23 = memref.load %arg1[%c29] : memref<64xf32, #tpu.memory_space<smem>>
    %c33 = arith.constant 33 : index
    %24 = memref.load %arg1[%c33] : memref<64xf32, #tpu.memory_space<smem>>
    %c37 = arith.constant 37 : index
    %25 = memref.load %arg1[%c37] : memref<64xf32, #tpu.memory_space<smem>>
    %c41 = arith.constant 41 : index
    %26 = memref.load %arg1[%c41] : memref<64xf32, #tpu.memory_space<smem>>
    %c45 = arith.constant 45 : index
    %27 = memref.load %arg1[%c45] : memref<64xf32, #tpu.memory_space<smem>>
    %c49 = arith.constant 49 : index
    %28 = memref.load %arg1[%c49] : memref<64xf32, #tpu.memory_space<smem>>
    %c53 = arith.constant 53 : index
    %29 = memref.load %arg1[%c53] : memref<64xf32, #tpu.memory_space<smem>>
    %c57 = arith.constant 57 : index
    %30 = memref.load %arg1[%c57] : memref<64xf32, #tpu.memory_space<smem>>
    %c61 = arith.constant 61 : index
    %31 = memref.load %arg1[%c61] : memref<64xf32, #tpu.memory_space<smem>>
    %c2 = arith.constant 2 : index
    %32 = memref.load %arg1[%c2] : memref<64xf32, #tpu.memory_space<smem>>
    %c6 = arith.constant 6 : index
    %33 = memref.load %arg1[%c6] : memref<64xf32, #tpu.memory_space<smem>>
    %c10 = arith.constant 10 : index
    %34 = memref.load %arg1[%c10] : memref<64xf32, #tpu.memory_space<smem>>
    %c14 = arith.constant 14 : index
    %35 = memref.load %arg1[%c14] : memref<64xf32, #tpu.memory_space<smem>>
    %c18 = arith.constant 18 : index
    %36 = memref.load %arg1[%c18] : memref<64xf32, #tpu.memory_space<smem>>
    %c22 = arith.constant 22 : index
    %37 = memref.load %arg1[%c22] : memref<64xf32, #tpu.memory_space<smem>>
    %c26 = arith.constant 26 : index
    %38 = memref.load %arg1[%c26] : memref<64xf32, #tpu.memory_space<smem>>
    %c30 = arith.constant 30 : index
    %39 = memref.load %arg1[%c30] : memref<64xf32, #tpu.memory_space<smem>>
    %c34 = arith.constant 34 : index
    %40 = memref.load %arg1[%c34] : memref<64xf32, #tpu.memory_space<smem>>
    %c38 = arith.constant 38 : index
    %41 = memref.load %arg1[%c38] : memref<64xf32, #tpu.memory_space<smem>>
    %c42 = arith.constant 42 : index
    %42 = memref.load %arg1[%c42] : memref<64xf32, #tpu.memory_space<smem>>
    %c46 = arith.constant 46 : index
    %43 = memref.load %arg1[%c46] : memref<64xf32, #tpu.memory_space<smem>>
    %c50 = arith.constant 50 : index
    %44 = memref.load %arg1[%c50] : memref<64xf32, #tpu.memory_space<smem>>
    %c54 = arith.constant 54 : index
    %45 = memref.load %arg1[%c54] : memref<64xf32, #tpu.memory_space<smem>>
    %c58 = arith.constant 58 : index
    %46 = memref.load %arg1[%c58] : memref<64xf32, #tpu.memory_space<smem>>
    %c62 = arith.constant 62 : index
    %47 = memref.load %arg1[%c62] : memref<64xf32, #tpu.memory_space<smem>>
    %c0_i32 = arith.constant 0 : i32
    %c1_i32 = arith.constant 1 : i32
    %48 = arith.muli %c0_i32, %c1_i32 : i32
    %c0_i32_0 = arith.constant 0 : i32
    %49 = arith.addi %c0_i32_0, %48 : i32
    %c8_i32 = arith.constant 8 : i32
    %50 = arith.muli %49, %c8_i32 : i32
    %51 = tpu.assume_multiple %50, 8 : i32
    %52 = arith.index_cast %51 : i32 to index
    %c0_1 = arith.constant 0 : index
    %53 = vector.load %arg2[%52, %c0_1] : memref<8x128xf32, #tpu.memory_space<vmem>>, vector<8x128xf32>
    %54 = arith.index_cast %51 : i32 to index
    %c0_2 = arith.constant 0 : index
    %55 = vector.load %arg3[%54, %c0_2] : memref<8x128xf32, #tpu.memory_space<vmem>>, vector<8x128xf32>
    %cst = arith.constant 0x7F800000 : f32
    %56 = vector.broadcast %cst : f32 to vector<8x128xf32>
    %57 = vector.broadcast %0 : f32 to vector<8x128xf32>
    %58 = arith.subf %53, %57 : vector<8x128xf32>
    %59 = vector.broadcast %16 : f32 to vector<8x128xf32>
    %60 = arith.subf %55, %59 : vector<8x128xf32>
    %61 = arith.mulf %58, %58 : vector<8x128xf32>
    %62 = arith.mulf %60, %60 : vector<8x128xf32>
    %63 = arith.addf %61, %62 : vector<8x128xf32>
    %64 = math.sqrt %63 : vector<8x128xf32>
    %65 = vector.broadcast %32 : f32 to vector<8x128xf32>
    %66 = arith.subf %64, %65 : vector<8x128xf32>
    %67 = arith.minimumf %56, %66 : vector<8x128xf32>
    %68 = vector.broadcast %1 : f32 to vector<8x128xf32>
    %69 = arith.subf %53, %68 : vector<8x128xf32>
    %70 = vector.broadcast %17 : f32 to vector<8x128xf32>
    %71 = arith.subf %55, %70 : vector<8x128xf32>
    %72 = arith.mulf %69, %69 : vector<8x128xf32>
    %73 = arith.mulf %71, %71 : vector<8x128xf32>
    %74 = arith.addf %72, %73 : vector<8x128xf32>
    %75 = math.sqrt %74 : vector<8x128xf32>
    %76 = vector.broadcast %33 : f32 to vector<8x128xf32>
    %77 = arith.subf %75, %76 : vector<8x128xf32>
    %78 = arith.minimumf %67, %77 : vector<8x128xf32>
    %79 = vector.broadcast %2 : f32 to vector<8x128xf32>
    %80 = arith.subf %53, %79 : vector<8x128xf32>
    %81 = vector.broadcast %18 : f32 to vector<8x128xf32>
    %82 = arith.subf %55, %81 : vector<8x128xf32>
    %83 = arith.mulf %80, %80 : vector<8x128xf32>
    %84 = arith.mulf %82, %82 : vector<8x128xf32>
    %85 = arith.addf %83, %84 : vector<8x128xf32>
    %86 = math.sqrt %85 : vector<8x128xf32>
    %87 = vector.broadcast %34 : f32 to vector<8x128xf32>
    %88 = arith.subf %86, %87 : vector<8x128xf32>
    %89 = arith.minimumf %78, %88 : vector<8x128xf32>
    %90 = vector.broadcast %3 : f32 to vector<8x128xf32>
    %91 = arith.subf %53, %90 : vector<8x128xf32>
    %92 = vector.broadcast %19 : f32 to vector<8x128xf32>
    %93 = arith.subf %55, %92 : vector<8x128xf32>
    %94 = arith.mulf %91, %91 : vector<8x128xf32>
    %95 = arith.mulf %93, %93 : vector<8x128xf32>
    %96 = arith.addf %94, %95 : vector<8x128xf32>
    %97 = math.sqrt %96 : vector<8x128xf32>
    %98 = vector.broadcast %35 : f32 to vector<8x128xf32>
    %99 = arith.subf %97, %98 : vector<8x128xf32>
    %100 = arith.minimumf %89, %99 : vector<8x128xf32>
    %101 = vector.broadcast %4 : f32 to vector<8x128xf32>
    %102 = arith.subf %53, %101 : vector<8x128xf32>
    %103 = vector.broadcast %20 : f32 to vector<8x128xf32>
    %104 = arith.subf %55, %103 : vector<8x128xf32>
    %105 = arith.mulf %102, %102 : vector<8x128xf32>
    %106 = arith.mulf %104, %104 : vector<8x128xf32>
    %107 = arith.addf %105, %106 : vector<8x128xf32>
    %108 = math.sqrt %107 : vector<8x128xf32>
    %109 = vector.broadcast %36 : f32 to vector<8x128xf32>
    %110 = arith.subf %108, %109 : vector<8x128xf32>
    %111 = arith.minimumf %100, %110 : vector<8x128xf32>
    %112 = vector.broadcast %5 : f32 to vector<8x128xf32>
    %113 = arith.subf %53, %112 : vector<8x128xf32>
    %114 = vector.broadcast %21 : f32 to vector<8x128xf32>
    %115 = arith.subf %55, %114 : vector<8x128xf32>
    %116 = arith.mulf %113, %113 : vector<8x128xf32>
    %117 = arith.mulf %115, %115 : vector<8x128xf32>
    %118 = arith.addf %116, %117 : vector<8x128xf32>
    %119 = math.sqrt %118 : vector<8x128xf32>
    %120 = vector.broadcast %37 : f32 to vector<8x128xf32>
    %121 = arith.subf %119, %120 : vector<8x128xf32>
    %122 = arith.minimumf %111, %121 : vector<8x128xf32>
    %123 = vector.broadcast %6 : f32 to vector<8x128xf32>
    %124 = arith.subf %53, %123 : vector<8x128xf32>
    %125 = vector.broadcast %22 : f32 to vector<8x128xf32>
    %126 = arith.subf %55, %125 : vector<8x128xf32>
    %127 = arith.mulf %124, %124 : vector<8x128xf32>
    %128 = arith.mulf %126, %126 : vector<8x128xf32>
    %129 = arith.addf %127, %128 : vector<8x128xf32>
    %130 = math.sqrt %129 : vector<8x128xf32>
    %131 = vector.broadcast %38 : f32 to vector<8x128xf32>
    %132 = arith.subf %130, %131 : vector<8x128xf32>
    %133 = arith.minimumf %122, %132 : vector<8x128xf32>
    %134 = vector.broadcast %7 : f32 to vector<8x128xf32>
    %135 = arith.subf %53, %134 : vector<8x128xf32>
    %136 = vector.broadcast %23 : f32 to vector<8x128xf32>
    %137 = arith.subf %55, %136 : vector<8x128xf32>
    %138 = arith.mulf %135, %135 : vector<8x128xf32>
    %139 = arith.mulf %137, %137 : vector<8x128xf32>
    %140 = arith.addf %138, %139 : vector<8x128xf32>
    %141 = math.sqrt %140 : vector<8x128xf32>
    %142 = vector.broadcast %39 : f32 to vector<8x128xf32>
    %143 = arith.subf %141, %142 : vector<8x128xf32>
    %144 = arith.minimumf %133, %143 : vector<8x128xf32>
    %145 = vector.broadcast %8 : f32 to vector<8x128xf32>
    %146 = arith.subf %53, %145 : vector<8x128xf32>
    %147 = vector.broadcast %24 : f32 to vector<8x128xf32>
    %148 = arith.subf %55, %147 : vector<8x128xf32>
    %149 = arith.mulf %146, %146 : vector<8x128xf32>
    %150 = arith.mulf %148, %148 : vector<8x128xf32>
    %151 = arith.addf %149, %150 : vector<8x128xf32>
    %152 = math.sqrt %151 : vector<8x128xf32>
    %153 = vector.broadcast %40 : f32 to vector<8x128xf32>
    %154 = arith.subf %152, %153 : vector<8x128xf32>
    %155 = arith.minimumf %144, %154 : vector<8x128xf32>
    %156 = vector.broadcast %9 : f32 to vector<8x128xf32>
    %157 = arith.subf %53, %156 : vector<8x128xf32>
    %158 = vector.broadcast %25 : f32 to vector<8x128xf32>
    %159 = arith.subf %55, %158 : vector<8x128xf32>
    %160 = arith.mulf %157, %157 : vector<8x128xf32>
    %161 = arith.mulf %159, %159 : vector<8x128xf32>
    %162 = arith.addf %160, %161 : vector<8x128xf32>
    %163 = math.sqrt %162 : vector<8x128xf32>
    %164 = vector.broadcast %41 : f32 to vector<8x128xf32>
    %165 = arith.subf %163, %164 : vector<8x128xf32>
    %166 = arith.minimumf %155, %165 : vector<8x128xf32>
    %167 = vector.broadcast %10 : f32 to vector<8x128xf32>
    %168 = arith.subf %53, %167 : vector<8x128xf32>
    %169 = vector.broadcast %26 : f32 to vector<8x128xf32>
    %170 = arith.subf %55, %169 : vector<8x128xf32>
    %171 = arith.mulf %168, %168 : vector<8x128xf32>
    %172 = arith.mulf %170, %170 : vector<8x128xf32>
    %173 = arith.addf %171, %172 : vector<8x128xf32>
    %174 = math.sqrt %173 : vector<8x128xf32>
    %175 = vector.broadcast %42 : f32 to vector<8x128xf32>
    %176 = arith.subf %174, %175 : vector<8x128xf32>
    %177 = arith.minimumf %166, %176 : vector<8x128xf32>
    %178 = vector.broadcast %11 : f32 to vector<8x128xf32>
    %179 = arith.subf %53, %178 : vector<8x128xf32>
    %180 = vector.broadcast %27 : f32 to vector<8x128xf32>
    %181 = arith.subf %55, %180 : vector<8x128xf32>
    %182 = arith.mulf %179, %179 : vector<8x128xf32>
    %183 = arith.mulf %181, %181 : vector<8x128xf32>
    %184 = arith.addf %182, %183 : vector<8x128xf32>
    %185 = math.sqrt %184 : vector<8x128xf32>
    %186 = vector.broadcast %43 : f32 to vector<8x128xf32>
    %187 = arith.subf %185, %186 : vector<8x128xf32>
    %188 = arith.minimumf %177, %187 : vector<8x128xf32>
    %189 = vector.broadcast %12 : f32 to vector<8x128xf32>
    %190 = arith.subf %53, %189 : vector<8x128xf32>
    %191 = vector.broadcast %28 : f32 to vector<8x128xf32>
    %192 = arith.subf %55, %191 : vector<8x128xf32>
    %193 = arith.mulf %190, %190 : vector<8x128xf32>
    %194 = arith.mulf %192, %192 : vector<8x128xf32>
    %195 = arith.addf %193, %194 : vector<8x128xf32>
    %196 = math.sqrt %195 : vector<8x128xf32>
    %197 = vector.broadcast %44 : f32 to vector<8x128xf32>
    %198 = arith.subf %196, %197 : vector<8x128xf32>
    %199 = arith.minimumf %188, %198 : vector<8x128xf32>
    %200 = vector.broadcast %13 : f32 to vector<8x128xf32>
    %201 = arith.subf %53, %200 : vector<8x128xf32>
    %202 = vector.broadcast %29 : f32 to vector<8x128xf32>
    %203 = arith.subf %55, %202 : vector<8x128xf32>
    %204 = arith.mulf %201, %201 : vector<8x128xf32>
    %205 = arith.mulf %203, %203 : vector<8x128xf32>
    %206 = arith.addf %204, %205 : vector<8x128xf32>
    %207 = math.sqrt %206 : vector<8x128xf32>
    %208 = vector.broadcast %45 : f32 to vector<8x128xf32>
    %209 = arith.subf %207, %208 : vector<8x128xf32>
    %210 = arith.minimumf %199, %209 : vector<8x128xf32>
    %211 = vector.broadcast %14 : f32 to vector<8x128xf32>
    %212 = arith.subf %53, %211 : vector<8x128xf32>
    %213 = vector.broadcast %30 : f32 to vector<8x128xf32>
    %214 = arith.subf %55, %213 : vector<8x128xf32>
    %215 = arith.mulf %212, %212 : vector<8x128xf32>
    %216 = arith.mulf %214, %214 : vector<8x128xf32>
    %217 = arith.addf %215, %216 : vector<8x128xf32>
    %218 = math.sqrt %217 : vector<8x128xf32>
    %219 = vector.broadcast %46 : f32 to vector<8x128xf32>
    %220 = arith.subf %218, %219 : vector<8x128xf32>
    %221 = arith.minimumf %210, %220 : vector<8x128xf32>
    %222 = vector.broadcast %15 : f32 to vector<8x128xf32>
    %223 = arith.subf %53, %222 : vector<8x128xf32>
    %224 = vector.broadcast %31 : f32 to vector<8x128xf32>
    %225 = arith.subf %55, %224 : vector<8x128xf32>
    %226 = arith.mulf %223, %223 : vector<8x128xf32>
    %227 = arith.mulf %225, %225 : vector<8x128xf32>
    %228 = arith.addf %226, %227 : vector<8x128xf32>
    %229 = math.sqrt %228 : vector<8x128xf32>
    %230 = vector.broadcast %47 : f32 to vector<8x128xf32>
    %231 = arith.subf %229, %230 : vector<8x128xf32>
    %232 = arith.minimumf %221, %231 : vector<8x128xf32>
    %233 = arith.index_cast %51 : i32 to index
    %c0_3 = arith.constant 0 : index
    %234 = vector.load %arg4[%233, %c0_3] : memref<8x128xf32, #tpu.memory_space<vmem>>, vector<8x128xf32>
    tpu.vector_store %arg4[%233, %c0_3], %232 {strides = array<i32>} : memref<8x128xf32, #tpu.memory_space<vmem>>, vector<8x128xf32>,
    %c1_i32_4 = arith.constant 1 : i32
    return
  }
  func.func @transform_0(%arg0: i32) -> i32 {
    %c0_i32 = arith.constant 0 : i32
    %c0_i32_0 = arith.constant 0 : i32
    return %c0_i32 : i32
  }
  func.func @transform_1(%arg0: i32) -> (i32, i32) {
    %c0_i32 = arith.constant 0 : i32
    %c0_i32_0 = arith.constant 0 : i32
    return %arg0, %c0_i32 : i32, i32
  }
  func.func @transform_2(%arg0: i32) -> (i32, i32) {
    %c0_i32 = arith.constant 0 : i32
    %c0_i32_0 = arith.constant 0 : i32
    return %arg0, %c0_i32 : i32, i32
  }
  func.func @transform_3(%arg0: i32) -> (i32, i32) {
    %c0_i32 = arith.constant 0 : i32
    %c0_i32_0 = arith.constant 0 : i32
    return %arg0, %c0_i32 : i32, i32
  }
}

</mosaic_0001>

<bundles_post_ra>
// kernel: tpu_custom_call.1
= control target key start
LH: loop header
LB: loop body
LE: loop exit
PB: predicated region body
PF: predicated region fallthrough
CT: control target
= control target key end

     0   :  { %8 = vsyncpa [#allocation5], 0  ;;  %s901_s0 = inlined_call_operand.hbm [shape: f32[64], index: 0, kind: input, shape index: {}]   ;;  %s902_s1 = inlined_call_operand.hbm [shape: f32[8,128], index: 1, kind: input, shape index: {}]   ;;  %s903_s2 = inlined_call_operand.hbm [shape: f32[8,128], index: 2, kind: input, shape index: {}]   ;;  %s904_s3 = inlined_call_operand.hbm [shape: f32[8,128], index: 3, kind: output, shape index: {}]  }
   0x1   :  { %9 = vsyncpa [#allocation3], 0 }
   0x2   :  { %10 = vsyncpa [#allocation8], 0 }
   0x3   :  { %11 = vsyncpa [#allocation4], 0  ;;  %s548_s12 = smov [#allocation2]   ;;  %s549_s15 = smov [#allocation6]  }
   0x4   :  { %19 = dma.hbm_to_smem %s901_s0, 16, %s548_s12, [#allocation5]  }
   0x5   :  { %s26_s16 = sshll.u32 %s549_s15, 4  ;;  %s550_s17 = smov [#allocation7]   ;;  %s27_s16 = int_to_ptr.vmem [resolvable:$true] %s26_s16 }
   0x6   :  { %s36_s18 = sshll.u32 %s550_s17, 4  ;;  %s488_s19 = scalar_lea.vmem %s27_s16, 128  ;;  %s37_s18 = int_to_ptr.vmem [resolvable:$true] %s36_s18 }
   0x7   :  { %p489_p0 = scmp.ne.s32.totalorder %s27_s16, %s488_s19  ;;  %p493_p1 = scmp.lt.s32.totalorder %s27_s16, %s27_s16 }
   0x8   :  { %p494_p2 = scmp.lt.s32.totalorder %s488_s19, %s488_s19 }
   0xa   :  { %p495_p3 = por %p494_p2, %p493_p1 }
   0xc   :  { %p496_p4 = pnand %p495_p3, %p489_p0 }
   0xe   :  { %499 = shalt.err (!%p496_p4)
}
   0xf   :  { %29 = dma.hbm_to_vmem [thread:$0]  %s902_s1, 128, %s27_s16, [#allocation3]  }
  0x10   :  { %s508_s22 = scalar_lea.vmem %s37_s18, 128  ;;  %p513_p6 = scmp.lt.s32.totalorder %s37_s18, %s37_s18 }
  0x11   :  { %p509_p5 = scmp.ne.s32.totalorder %s37_s18, %s508_s22  ;;  %p514_p7 = scmp.lt.s32.totalorder %s508_s22, %s508_s22 }
  0x13   :  { %p515_p8 = por %p514_p7, %p513_p6 }
  0x15   :  { %p516_p9 = pnand %p515_p8, %p509_p5 }
  0x17   :  { %519 = shalt.err (!%p516_p9)
}
  0x18   :  { %39 = dma.hbm_to_vmem [thread:$0]  %s903_s2, 128, %s37_s18, [#allocation8]  }
  0x19   :  { %540 = dma.done.wait [#allocation5], 16  }
  0x1a   :  { %541 = vsyncadd [#allocation5], 4294967280 }
  0x1b   :  { %542 = dma.done.wait [#allocation3], 128  }
  0x1c   :  { %543 = vsyncadd [#allocation3], 4294967168 }
  0x1d   :  { %544 = dma.done.wait [#allocation8], 128  }
  0x1e   :  { %545 = vsyncadd [#allocation8], 4294967168 }
  0x1f   :  { %49 = sfence }
  0x20   :  { %s50_s1 = sld [smem:[#allocation2]]  ;;  %v591_v0 = vld [vmem:[#allocation6] sm:$0xff]  ;;  %v614_v18 = vld [vmem:[#allocation7] sm:$0xff] }
  0x21   :  { %s389_s24 = sld [smem:[#allocation2 + $0x4]] }
  0x22   :  { %s390_s25 = sld [smem:[#allocation2 + $0x8]] }
  0x23   :  { %s391_s26 = sld [smem:[#allocation2 + $0xc]] }
  0x24   :  { %s392_s27 = sld [smem:[#allocation2 + $0x10]] }
  0x25   :  { %s393_s28 = sld [smem:[#allocation2 + $0x14]] }
  0x26   :  { %s394_s29 = sld [smem:[#allocation2 + $0x18]]  ;;  %v100_v1 = vstv %s50_s1 }
  0x27   :  { %s395_s30 = sld [smem:[#allocation2 + $0x1c]]  ;;  %v116_v2 = vstv %s389_s24  ;;  %v101_v8 = vsub.f32 %v591_v0, %v100_v1 }
  0x28   :  { %s581_s4 = sld [smem:[#allocation2 + $0x20]]  ;;  %v133_v3 = vstv %s390_s25  ;;  %v117_v10 = vsub.f32 %v591_v0, %v116_v2 }
  0x29   :  { %s583_s5 = sld [smem:[#allocation2 + $0x24]]  ;;  %v150_v4 = vstv %s391_s26  ;;  %v134_v11 = vsub.f32 %v591_v0, %v133_v3  ;;  %v104_v21 = vmul.f32 %v101_v8, %v101_v8 }
  0x2a   :  { %s585_s2 = sld [smem:[#allocation2 + $0x28]]  ;;  %v167_v5 = vstv %s392_s27  ;;  %v151_v12 = vsub.f32 %v591_v0, %v150_v4  ;;  %v120_v22 = vmul.f32 %v117_v10, %v117_v10 }
  0x2b   :  { %s587_s6 = sld [smem:[#allocation2 + $0x2c]]  ;;  %v184_v6 = vstv %s393_s28  ;;  %v168_v14 = vsub.f32 %v591_v0, %v167_v5  ;;  %v137_v23 = vmul.f32 %v134_v11, %v134_v11 }
  0x2c   :  { %s589_s7 = sld [smem:[#allocation2 + $0x30]]  ;;  %v201_v7 = vstv %s394_s29  ;;  %v185_v15 = vsub.f32 %v591_v0, %v184_v6  ;;  %v154_v24 = vmul.f32 %v151_v12, %v151_v12 }
  0x2d   :  { %s593_s8 = sld [smem:[#allocation2 + $0x34]]  ;;  %v218_v9 = vstv %s395_s30  ;;  %v202_v16 = vsub.f32 %v591_v0, %v201_v7  ;;  %v171_v26 = vmul.f32 %v168_v14, %v168_v14 }
  0x2e   :  { %s595_s9 = sld [smem:[#allocation2 + $0x38]]  ;;  %v235_v13 = vstv %s581_s4  ;;  %v219_v17 = vsub.f32 %v591_v0, %v218_v9  ;;  %v188_v27 = vmul.f32 %v185_v15, %v185_v15 }
  0x2f   :  { %s404_s10 = sld [smem:[#allocation2 + $0x1]]  ;;  %v236_v19 = vsub.f32 %v591_v0, %v235_v13  ;;  %v252_v20 = vstv %s583_s5  ;;  %v622_v28 = vmul.f32 %v202_v16, %v202_v16 }
  0x30   :  { %s598_s11 = sld [smem:[#allocation2 + $0x5]]  ;;  %v628_v31 = vmul.f32 %v219_v17, %v219_v17  ;;  %v253_v32 = vsub.f32 %v591_v0, %v252_v20  ;;  %v269_v36 = vstv %s585_s2 }
  0x31   :  { %s604_s12 = sld [smem:[#allocation2 + $0x9]]  ;;  %v635_v35 = vmul.f32 %v236_v19, %v236_v19  ;;  %v286_v40 = vstv %s587_s6  ;;  %v270_v52 = vsub.f32 %v591_v0, %v269_v36 }
  0x32   :  { %s609_s13 = sld [smem:[#allocation2 + $0xd]]  ;;  %v303_v44 = vstv %s589_s7  ;;  %v287_v54 = vsub.f32 %v591_v0, %v286_v40  ;;  %v661_v56 = vmul.f32 %v253_v32, %v253_v32 }
  0x33   :  { %s612_s14 = sld [smem:[#allocation2 + $0x11]]  ;;  %v320_v55 = vstv %s593_s8  ;;  %v304_v57 = vsub.f32 %v591_v0, %v303_v44  ;;  %v671_v2 = vmul.f32 %v270_v52, %v270_v52 }
  0x34   :  { %s618_s15 = sld [smem:[#allocation2 + $0x15]]  ;;  %v337_v58 = vstv %s595_s9  ;;  %v321_v3 = vsub.f32 %v591_v0, %v320_v55  ;;  %v678_v5 = vmul.f32 %v287_v54, %v287_v54 }
  0x35   :  { %s620_s16 = sld [smem:[#allocation2 + $0x19]]  ;;  %v102_v25 = vstv %s404_s10  ;;  %v685_v8 = vmul.f32 %v304_v57, %v304_v57  ;;  %v688_v9 = vsub.f32 %v591_v0, %v337_v58 }
  0x36   :  { %s624_s17 = sld [smem:[#allocation2 + $0x3c]]  ;;  %v103_v29 = vsub.f32 %v614_v18, %v102_v25  ;;  %v118_v30 = vstv %s598_s11  ;;  %v699_v15 = vmul.f32 %v321_v3, %v321_v3 }
  0x37   :  { %s631_s18 = sld [smem:[#allocation2 + $0x1d]]  ;;  %v119_v33 = vsub.f32 %v614_v18, %v118_v30  ;;  %v135_v34 = vstv %s604_s12 }
  0x38   :  { %s638_s19 = sld [smem:[#allocation2 + $0x21]]  ;;  %v105_v37 = vmul.f32 %v103_v29, %v103_v29  ;;  %v136_v38 = vsub.f32 %v614_v18, %v135_v34  ;;  %v152_v39 = vstv %s609_s13  ;;  %s551_s13 = smov [#allocation9]  }
  0x39   :  { %s643_s20 = sld [smem:[#allocation2 + $0x25]]  ;;  %v121_v41 = vmul.f32 %v119_v33, %v119_v33  ;;  %v153_v42 = vsub.f32 %v614_v18, %v152_v39  ;;  %v169_v43 = vstv %s612_s14  ;;  %s378_s14 = sshll.u32 %s551_s13, 4  ;;  %s379_s14 = int_to_ptr.vmem [resolvable:$true] %s378_s14 }
  0x3a   :  { %v648_v45 = vadd.f32 %v105_v37, %v104_v21  ;;  %v138_v46 = vmul.f32 %v136_v38, %v136_v38  ;;  %v170_v47 = vsub.f32 %v614_v18, %v169_v43  ;;  %v186_v48 = vstv %s618_s15  ;;  %s674_s21 = sld [smem:[#allocation2 + $0x29]]  ;;  %s520_s15 = scalar_lea.vmem %s379_s14, 128 }
  0x3b   :  { %v652_v49 = vadd.f32 %v121_v41, %v120_v22  ;;  %v155_v50 = vmul.f32 %v153_v42, %v153_v42  ;;  %v187_v51 = vsub.f32 %v614_v18, %v186_v48  ;;  %v203_v53 = vstv %s620_s16  ;;  %s681_s22 = sld [smem:[#allocation2 + $0x2d]]  ;;  %p521_p10 = scmp.ne.s32.totalorder %s379_s14, %s520_s15 }
  0x3c   :  { %440 = vrsqrt.f32 %v648_v45  ;;  %v665_v59 = vadd.f32 %v138_v46, %v137_v23  ;;  %v172_v61 = vmul.f32 %v170_v47, %v170_v47  ;;  %v204_v63 = vsub.f32 %v614_v18, %v203_v53  ;;  %s690_s0 = sld [smem:[#allocation2 + $0x2]]  ;;  %p525_p11 = scmp.lt.s32.totalorder %s379_s14, %s379_s14 }
  0x3d   :  { %442 = vrsqrt.f32 %v652_v49  ;;  %v667_v60 = vadd.f32 %v155_v50, %v154_v24  ;;  %v189_v62 = vmul.f32 %v187_v51, %v187_v51  ;;  %v220_v1 = vstv %s631_s18  ;;  %s704_s23 = sld [smem:[#allocation2 + $0x6]]  ;;  %p526_p12 = scmp.lt.s32.totalorder %s520_s15, %s520_s15 }
  0x3e   :  { %444 = vrsqrt.f32 %v665_v59  ;;  %v237_v4 = vstv %s638_s19  ;;  %v354_v6 = vstv %s624_s17  ;;  %v692_v10 = vadd.f32 %v172_v61, %v171_v26  ;;  %s710_s1 = sld [smem:[#allocation2 + $0xa]] }
  0x3f   :  { %446 = vrsqrt.f32 %v667_v60  ;;  %v254_v7 = vstv %s643_s20  ;;  %v694_v11 = vadd.f32 %v189_v62, %v188_v27  ;;  %v206_v12 = vmul.f32 %v204_v63, %v204_v63  ;;  %s716_s24 = sld [smem:[#allocation2 + $0xe]]  ;;  %p527_p13 = por %p526_p12, %p525_p11 }
  0x40   :  { %v221_v13 = vsub.f32 %v614_v18, %v220_v1  ;;  %vm109_vm0 = vcmp.eq.f32.partialorder %v648_v45, inf  ;;  %v238_v14 = vsub.f32 %v614_v18, %v237_v4  ;;  %v702_v16 = vsub.f32 %v591_v0, %v354_v6  ;;  %s726_s25 = sld [smem:[#allocation2 + $0x12]] }
  0x41   :  { %vm111_vm1 = vcmp.eq.f32.partialorder %v648_v45, 0.0  ;;  %v112_v17 = vand.u32 2147483648, %v648_v45  ;;  %448 = vrsqrt.f32 %v692_v10  ;;  %v255_v19 = vsub.f32 %v614_v18, %v254_v7  ;;  %s739_s26 = sld [smem:[#allocation2 + $0x16]]  ;;  %p528_p0 = pnand %p527_p13, %p521_p10 }
  0x42   :  { %vm125_vm2 = vcmp.eq.f32.partialorder %v652_v49, inf  ;;  %vm127_vm3 = vcmp.eq.f32.partialorder %v652_v49, 0.0  ;;  %v128_v0 = vand.u32 2147483648, %v652_v49  ;;  %450 = vrsqrt.f32 %v694_v11  ;;  %s746_s27 = sld [smem:[#allocation2 + $0x1a]] }
  0x43   :  { %vm142_vm4 = vcmp.eq.f32.partialorder %v665_v59, inf  ;;  %vm144_vm5 = vcmp.eq.f32.partialorder %v665_v59, 0.0  ;;  %v721_v20 = vadd.f32 %v206_v12, %v622_v28  ;;  %v223_v21 = vmul.f32 %v221_v13, %v221_v13  ;;  %s771_s28 = sld [smem:[#allocation2 + $0x1e]] }
  0x44   :  { %v145_v22 = vand.u32 2147483648, %v665_v59  ;;  %vm159_vm6 = vcmp.eq.f32.partialorder %v667_v60, inf  ;;  %vm161_vm7 = vcmp.eq.f32.partialorder %v667_v60, 0.0  ;;  %v240_v23 = vmul.f32 %v238_v14, %v238_v14  ;;  %s775_s29 = sld [smem:[#allocation2 + $0x31]] }
  0x45   :  { %v162_v24 = vand.u32 2147483648, %v667_v60  ;;  %452 = vrsqrt.f32 %v721_v20  ;;  %v257_v25 = vmul.f32 %v255_v19, %v255_v19  ;;  %v271_v26 = vstv %s674_s21  ;;  %s789_s30 = sld [smem:[#allocation2 + $0x35]] }
  0x46   :  { %vm176_vm8 = vcmp.eq.f32.partialorder %v692_v10, inf  ;;  %v733_v28 = vadd.f32 %v223_v21, %v628_v31  ;;  %v736_v29 = vadd.f32 %v240_v23, %v635_v35  ;;  %v288_v30 = vstv %s681_s22  ;;  %s800_s4 = sld [smem:[#allocation2 + $0x22]] }
  0x47   :  { %v114_v34 = vstv %s690_s0  ;;  %vm178_vm9 = vcmp.eq.f32.partialorder %v692_v10, 0.0  ;;  %v179_v36 = vand.u32 2147483648, %v692_v10  ;;  %vm193_vm10 = vcmp.eq.f32.partialorder %v694_v11, inf  ;;  %s814_s5 = sld [smem:[#allocation2 + $0x39]] }
  0x48   :  { %vm195_vm11 = vcmp.eq.f32.partialorder %v694_v11, 0.0  ;;  %454 = vrsqrt.f32 %v733_v28  ;;  %v272_v35 = vsub.f32 %v614_v18, %v271_v26  ;;  %v130_v38 = vstv %s704_s23  ;;  %s821_s2 = sld [smem:[#allocation2 + $0x3d]] }
  0x49   :  { %v441_v27 = vpop.eup %440  ;;  %v196_v39 = vand.u32 2147483648, %v694_v11  ;;  %v758_v40 = vadd.f32 %v257_v25, %v661_v56  ;;  %v147_v44 = vstv %s710_s1  ;;  %456 = vrsqrt.f32 %v736_v29  ;;  %s828_s6 = sld [smem:[#allocation2 + $0x26]] }
  0x4a   :  { %v443_v32 = vpop.eup %442  ;;  %v108_v33 = vmul.f32 %v441_v27, %v648_v45  ;;  %v164_v51 = vstv %s716_s24  ;;  %vm210_vm12 = vcmp.eq.f32.partialorder %v721_v20, inf  ;;  %v274_v53 = vmul.f32 %v272_v35, %v272_v35  ;;  %s853_s7 = sld [smem:[#allocation2 + $0x2a]] }
  0x4b   :  { %v124_v31 = vmul.f32 %v443_v32, %v652_v49  ;;  %v445_v41 = vpop.eup %444  ;;  %vm212_vm13 = vcmp.eq.f32.partialorder %v721_v20, 0.0  ;;  %458 = vrsqrt.f32 %v758_v40  ;;  %v213_v61 = vand.u32 2147483648, %v721_v20  ;;  %s868_s8 = sld [smem:[#allocation2 + $0x2e]] }
  0x4c   :  { %v110_v37 = vsel %vm109_vm0, %v648_v45, %v108_v33  ;;  %v447_v46 = vpop.eup %446  ;;  %v141_v50 = vmul.f32 %v445_v41, %v665_v59  ;;  %v198_v4 = vstv %s739_s26  ;;  %v215_v7 = vstv %s746_s27  ;;  %s880_s9 = sld [smem:[#allocation2 + $0x32]] }
  0x4d   :  { %v113_v42 = vsel %vm111_vm1, %v112_v17, %v110_v37  ;;  %v126_v43 = vsel %vm125_vm2, %v652_v49, %v124_v31  ;;  %v158_v52 = vmul.f32 %v447_v46, %v667_v60  ;;  %v181_v49 = vstv %s726_s25  ;;  %s887_s10 = sld [smem:[#allocation2 + $0x36]] }
  0x4e   :  { %v115_v47 = vsub.f32 %v113_v42, %v114_v34  ;;  %v129_v48 = vsel %vm127_vm3, %v128_v0, %v126_v43  ;;  %v143_v54 = vsel %vm142_vm4, %v665_v59, %v141_v50  ;;  %v449_v55 = vpop.eup %448  ;;  %v798_v12 = vadd.f32 %v274_v53, %v671_v2  ;;  %s890_s11 = sld [smem:[#allocation2 + $0x3a]] }
  0x4f   :  { %v131_v45 = vsub.f32 %v129_v48, %v130_v38  ;;  %v146_v57 = vsel %vm144_vm5, %v145_v22, %v143_v54  ;;  %v160_v58 = vsel %vm159_vm6, %v667_v60, %v158_v52  ;;  %v451_v62 = vpop.eup %450  ;;  %v175_v3 = vmul.f32 %v449_v55, %v692_v10  ;;  %s893_s12 = sld [smem:[#allocation2 + $0x3e]] }
  0x50   :  { %v148_v63 = vsub.f32 %v146_v57, %v147_v44  ;;  %v163_v1 = vsel %vm161_vm7, %v162_v24, %v160_v58  ;;  %v192_v59 = vmul.f32 %v451_v62, %v694_v11  ;;  %vm227_vm14 = vcmp.eq.f32.partialorder %v733_v28, inf }
  0x51   :  { %v132_v56 = vmin.f32 %v115_v47, %v131_v45  ;;  %v165_v6 = vsub.f32 %v163_v1, %v164_v51  ;;  %v177_v14 = vsel %vm176_vm8, %v692_v10, %v175_v3  ;;  %v289_v60 = vsub.f32 %v614_v18, %v288_v30 }
  0x52   :  { %v453_v17 = vpop.eup %452  ;;  %v180_v19 = vsel %vm178_vm9, %v179_v36, %v177_v14  ;;  %v194_v2 = vsel %vm193_vm10, %v694_v11, %v192_v59  ;;  %vm229_vm15 = vcmp.eq.f32.partialorder %v733_v28, 0.0  ;;  %460 = vrsqrt.f32 %v798_v12 }
  0x53   :  { %v149_v13 = vmin.f32 %v132_v56, %v148_v63  ;;  %v182_v21 = vsub.f32 %v180_v19, %v181_v49  ;;  %v197_v22 = vsel %vm195_vm11, %v196_v39, %v194_v2  ;;  %v209_v23 = vmul.f32 %v453_v17, %v721_v20 }
  0x54   :  { %v199_v10 = vsub.f32 %v197_v22, %v198_v4  ;;  %v230_v24 = vand.u32 2147483648, %v733_v28  ;;  %v232_v25 = vstv %s771_s28  ;;  %v291_v26 = vmul.f32 %v289_v60, %v289_v60 }
  0x55   :  { %v166_v0 = vmin.f32 %v149_v13, %v165_v6  ;;  %v455_v27 = vpop.eup %454  ;;  %v211_v32 = vsel %vm210_vm12, %v721_v20, %v209_v23  ;;  %vm244_vm0 = vcmp.eq.f32.partialorder %v736_v29, inf  ;;  %v305_v11 = vstv %s775_s29 }
  0x56   :  { %v214_v33 = vsel %vm212_vm13, %v213_v61, %v211_v32  ;;  %v226_v34 = vmul.f32 %v455_v27, %v733_v28  ;;  %v834_v36 = vadd.f32 %v291_v26, %v678_v5  ;;  %v306_v31 = vsub.f32 %v614_v18, %v305_v11  ;;  %v457_v35 = vpop.eup %456 }
  0x57   :  { %v183_v30 = vmin.f32 %v166_v0, %v182_v21  ;;  %v216_v38 = vsub.f32 %v214_v33, %v215_v7  ;;  %v247_v39 = vand.u32 2147483648, %v736_v29  ;;  %v322_v41 = vstv %s789_s30 }
  0x58   :  { %v228_v42 = vsel %vm227_vm14, %v733_v28, %v226_v34  ;;  %v243_v20 = vmul.f32 %v457_v35, %v736_v29  ;;  %vm246_vm1 = vcmp.eq.f32.partialorder %v736_v29, 0.0  ;;  %462 = vrsqrt.f32 %v834_v36  ;;  %v459_v46 = vpop.eup %458 }
  0x59   :  { %v200_v37 = vmin.f32 %v183_v30, %v199_v10  ;;  %v231_v43 = vsel %vm229_vm15, %v230_v24, %v228_v42  ;;  %v249_v44 = vstv %s800_s4  ;;  %vm261_vm2 = vcmp.eq.f32.partialorder %v758_v40, inf }
  0x5a   :  { %v233_v47 = vsub.f32 %v231_v43, %v232_v25  ;;  %v245_v48 = vsel %vm244_vm0, %v736_v29, %v243_v20  ;;  %v308_v50 = vmul.f32 %v306_v31, %v306_v31  ;;  %v323_v51 = vsub.f32 %v614_v18, %v322_v41 }
  0x5b   :  { %v217_v5 = vmin.f32 %v200_v37, %v216_v38  ;;  %v248_v45 = vsel %vm246_vm1, %v247_v39, %v245_v48  ;;  %v260_v28 = vmul.f32 %v459_v46, %v758_v40  ;;  %v264_v52 = vand.u32 2147483648, %v758_v40 }
  0x5c   :  { %v339_v53 = vstv %s814_s5  ;;  %vm263_vm3 = vcmp.eq.f32.partialorder %v758_v40, 0.0  ;;  %v309_v49 = vadd.f32 %v308_v50, %v685_v8  ;;  %v325_v55 = vmul.f32 %v323_v51, %v323_v51 }
  0x5d   :  { %v234_v54 = vmin.f32 %v217_v5, %v233_v47  ;;  %v250_v56 = vsub.f32 %v248_v45, %v249_v44  ;;  %v262_v29 = vsel %vm261_vm2, %v758_v40, %v260_v28  ;;  %v340_v57 = vsub.f32 %v614_v18, %v339_v53 }
  0x5e   :  { %v356_v58 = vstv %s821_s2  ;;  %v266_v61 = vstv %s828_s6  ;;  %464 = vrsqrt.f32 %v309_v49  ;;  %v341_v62 = vmul.f32 %v688_v9, %v688_v9 }
  0x5f   :  { %v461_v63 = vpop.eup %460  ;;  %v265_v1 = vsel %vm263_vm3, %v264_v52, %v262_v29  ;;  %vm278_vm4 = vcmp.eq.f32.partialorder %v798_v12, inf  ;;  %v281_v8 = vand.u32 2147483648, %v798_v12  ;;  %v326_v3 = vadd.f32 %v325_v55, %v699_v15 }
  0x60   :  { %v277_v40 = vmul.f32 %v461_v63, %v798_v12  ;;  %vm280_vm5 = vcmp.eq.f32.partialorder %v798_v12, 0.0  ;;  %v342_v4 = vmul.f32 %v340_v57, %v340_v57  ;;  %v357_v6 = vsub.f32 %v614_v18, %v356_v58 }
  0x61   :  { %v251_v59 = vmin.f32 %v234_v54, %v250_v56  ;;  %466 = vrsqrt.f32 %v326_v3  ;;  %v358_v9 = vmul.f32 %v702_v16, %v702_v16  ;;  %v267_v7 = vsub.f32 %v265_v1, %v266_v61 }
  0x62   :  { %v279_v13 = vsel %vm278_vm4, %v798_v12, %v277_v40  ;;  %v343_v14 = vadd.f32 %v342_v4, %v341_v62  ;;  %v359_v60 = vmul.f32 %v357_v6, %v357_v6  ;;  %v283_v15 = vstv %s853_s7 }
  0x63   :  { %v282_v17 = vsel %vm280_vm5, %v281_v8, %v279_v13  ;;  %vm295_vm6 = vcmp.eq.f32.partialorder %v834_v36, inf  ;;  %v298_v18 = vand.u32 2147483648, %v834_v36  ;;  %v268_v0 = vmin.f32 %v251_v59, %v267_v7 }
  0x64   :  { %468 = vrsqrt.f32 %v343_v14  ;;  %v360_v2 = vadd.f32 %v359_v60, %v358_v9  ;;  %v284_v21 = vsub.f32 %v282_v17, %v283_v15  ;;  %vm297_vm7 = vcmp.eq.f32.partialorder %v834_v36, 0.0 }
  0x65   :  { %v463_v19 = vpop.eup %462  ;;  %v300_v12 = vstv %s868_s8  ;;  %vm312_vm8 = vcmp.eq.f32.partialorder %v309_v49, inf  ;;  %v315_v26 = vand.u32 2147483648, %v309_v49  ;;  %vm314_vm9 = vcmp.eq.f32.partialorder %v309_v49, 0.0 }
  0x66   :  { %v294_v16 = vmul.f32 %v463_v19, %v834_v36  ;;  %470 = vrsqrt.f32 %v360_v2  ;;  %v285_v10 = vmin.f32 %v268_v0, %v284_v21  ;;  %v317_v30 = vstv %s880_s9 }
  0x67   :  { %vm329_vm10 = vcmp.eq.f32.partialorder %v326_v3, inf  ;;  %v332_v34 = vand.u32 2147483648, %v326_v3  ;;  %vm331_vm11 = vcmp.eq.f32.partialorder %v326_v3, 0.0  ;;  %v334_v37 = vstv %s887_s10 }
  0x68   :  { %v296_v22 = vsel %vm295_vm6, %v834_v36, %v294_v16  ;;  %vm346_vm12 = vcmp.eq.f32.partialorder %v343_v14, inf  ;;  %v349_v41 = vand.u32 2147483648, %v343_v14  ;;  %vm348_vm13 = vcmp.eq.f32.partialorder %v343_v14, 0.0 }
  0x69   :  { %v299_v23 = vsel %vm297_vm7, %v298_v18, %v296_v22  ;;  %v351_v44 = vstv %s890_s11  ;;  %vm363_vm14 = vcmp.eq.f32.partialorder %v360_v2, inf  ;;  %v366_v48 = vand.u32 2147483648, %v360_v2 }
  0x6a   :  { %v301_v24 = vsub.f32 %v299_v23, %v300_v12  ;;  %vm365_vm15 = vcmp.eq.f32.partialorder %v360_v2, 0.0  ;;  %v368_v52 = vstv %s893_s12 }
  0x6b   :  { %v465_v25 = vpop.eup %464 }
  0x6c   :  { %v311_v27 = vmul.f32 %v465_v25, %v309_v49  ;;  %v302_v11 = vmin.f32 %v285_v10, %v301_v24 }
  0x6e   :  { %v467_v32 = vpop.eup %466  ;;  %v313_v33 = vsel %vm312_vm8, %v309_v49, %v311_v27 }
  0x6f   :  { %v316_v36 = vsel %vm314_vm9, %v315_v26, %v313_v33  ;;  %v328_v31 = vmul.f32 %v467_v32, %v326_v3 }
  0x70   :  { %v318_v35 = vsub.f32 %v316_v36, %v317_v30 }
  0x71   :  { %v469_v38 = vpop.eup %468  ;;  %v330_v39 = vsel %vm329_vm10, %v326_v3, %v328_v31 }
  0x72   :  { %v319_v42 = vmin.f32 %v302_v11, %v318_v35  ;;  %v333_v20 = vsel %vm331_vm11, %v332_v34, %v330_v39  ;;  %v345_v5 = vmul.f32 %v469_v38, %v343_v14 }
  0x73   :  { %v335_v43 = vsub.f32 %v333_v20, %v334_v37  ;;  %v471_v46 = vpop.eup %470 }
  0x74   :  { %v347_v47 = vsel %vm346_vm12, %v343_v14, %v345_v5  ;;  %v362_v45 = vmul.f32 %v471_v46, %v360_v2 }
  0x75   :  { %v336_v50 = vmin.f32 %v319_v42, %v335_v43  ;;  %v350_v51 = vsel %vm348_vm13, %v349_v41, %v347_v47 }
  0x76   :  { %v352_v28 = vsub.f32 %v350_v51, %v351_v44  ;;  %v364_v53 = vsel %vm363_vm14, %v360_v2, %v362_v45 }
  0x77   :  { %v367_v49 = vsel %vm365_vm15, %v366_v48, %v364_v53 }
  0x78   :  { %v353_v54 = vmin.f32 %v336_v50, %v352_v28  ;;  %v369_v55 = vsub.f32 %v367_v49, %v368_v52 }
  0x7a   :  { %v370_v56 = vmin.f32 %v353_v54, %v369_v55 }
  0x7c   :  { %371 = vst [vmem:[#allocation9] sm:$0xff] %v370_v56 }
  0x7d   :  { %531 = shalt.err (!%p528_p0)
}
  0x7e   :  { %381 = dma.vmem_to_hbm [thread:$0]  %s379_s14, 128, %s904_s3, [#allocation4]  }
  0x7f   :  { %546 = dma.done.wait [#allocation4], 128  }
  0x80   :  { %547 = vsyncadd [#allocation4], 4294967168 }
  0x81   :  { %385 = vsyncpa [#allocation3], 1 }
  0x82   :  { %386 = vsyncpa [#allocation8], 1 }
  0x83   :  { %387 = vsyncpa [#allocation4], 1 }
  0x84   :  { %388 = vsyncpa [#allocation5], 1 }

</bundles_post_ra>
